<compile_context>
chip_gen: v5e
topology: v5e:2x2
jax: 0.10.0
libtpu: 0.0.40
codegen_flags: <defaults>
</compile_context>

<pallas_src>
import functools

import jax
import jax.numpy as jnp
from jax import lax
from jax.experimental import pallas as pl
from jax.experimental.pallas import tpu as pltpu

_LANE = 128
_F32_SUBLANE = 8
_CHUNK_ROWS = 512          # rows per accumulation chunk (multiple of 8/16/32)
_TARGET_MIN_BLOCKS = 4     # keep >=4 grid steps for dual-TC balance on v7x


def _round_up(x, m):
    return (x + m - 1) // m * m


def _sublane_multiple(dtype):
    itemsize = jnp.dtype(dtype).itemsize
    if itemsize >= 4:
        return 8
    if itemsize == 2:
        return 16
    return 32


def _generation_budgets():
    """(max_block_rows, tile_budget_bytes, vmem_limit_bytes) keyed on TPU gen."""
    try:
        kind = jax.devices()[0].device_kind.lower()
    except Exception:
        kind = ""
    if any(g in kind for g in ("v4", "v5", "v6")):
        # 128 MiB VMEM: bigger steps further amortize per-grid-step overhead.
        return 16384, 32 * 1024 * 1024, 64 * 1024 * 1024
    # v7x (64 MiB VMEM per TensorCore) and unknown chips: leave headroom.
    return 8192, 24 * 1024 * 1024, 48 * 1024 * 1024


def _partial_sum_kernel(pred_ref, target_ref, partial_ref, *, total_rows,
                        block_rows, chunk_rows, num_chunks, num_blocks,
                        need_mask):
    """Per-block partial sum of pred*target, folded to an (8, C) f32 tile.

    The block is consumed in `chunk_rows`-row chunks accumulated into one
    (8, C) f32 carry, so no multi-MiB f32 intermediate is materialized.
    """
    cols = partial_ref.shape[-1]
    block_start = pl.program_id(0) * block_rows

    def chunk_sum(c, masked):
        off = c * chunk_rows
        if not isinstance(off, int):
            off = pl.multiple_of(off, chunk_rows)
        # Upcast in-kernel so HBM traffic stays at the native input dtype.
        p = pred_ref[pl.ds(off, chunk_rows), :].astype(jnp.float32)
        t = target_ref[pl.ds(off, chunk_rows), :].astype(jnp.float32)
        prod = p * t
        if masked:
            # Zero rows past the end of the array (Pallas pads the ragged last
            # block with undefined data).
            row_ids = lax.broadcasted_iota(jnp.int32, prod.shape, 0)
            valid = (block_start + off + row_ids) < total_rows
            prod = jnp.where(valid, prod, 0.0)
        # (chunk_rows, C) -> (chunk_rows/8, 8, C) -> sum over axis 0:
        # pure VPU vreg adds, no XLU reduce-to-scalar in the hot loop.
        return prod.reshape(chunk_rows // _F32_SUBLANE, _F32_SUBLANE,
                            cols).sum(axis=0)

    def accumulate(masked):
        if num_chunks == 1:
            return chunk_sum(0, masked)
        init = jnp.zeros((_F32_SUBLANE, cols), jnp.float32)
        return lax.fori_loop(0, num_chunks,
                             lambda c, acc: acc + chunk_sum(c, masked),
                             init, unroll=min(num_chunks, 8))

    if not need_mask:
        partial_ref[...] = accumulate(False)
    elif num_blocks == 1:
        partial_ref[...] = accumulate(True)
    else:
        is_last = pl.program_id(0) == pl.num_programs(0) - 1

        @pl.when(jnp.logical_not(is_last))
        def _():
            partial_ref[...] = accumulate(False)   # fast path: no mask filler

        @pl.when(is_last)
        def _():
            partial_ref[...] = accumulate(True)    # masked ragged tail only


def custom_loss(pred, target):
    """Pallas equivalent of CustomLoss.forward(pred, target)."""
    assert pred.shape == target.shape, "pred/target must have the same shape"
    n_elems = int(pred.size)
    assert n_elems > 0, "empty input would divide by zero in the mean"

    # Collapse ONLY the leading dims (free for contiguous / tiled layouts).
    # Flattening into the lane dim or jnp.pad-ing would each cost a full extra
    # HBM pass over both inputs for a purely HBM-bound kernel.
    cols = pred.shape[-1] if pred.ndim >= 2 else n_elems
    rows = n_elems // cols
    p2 = pred.reshape(rows, cols)
    t2 = target.reshape(rows, cols)

    sublane_mult = max(_sublane_multiple(p2.dtype), _sublane_multiple(t2.dtype))
    if rows < sublane_mult:
        # Degenerate leading extent: tiny zero-row pad (zeros don't change the
        # sum; the divisor below stays n_elems).
        pad = sublane_mult - rows
        p2 = jnp.pad(p2, ((0, pad), (0, 0)))
        t2 = jnp.pad(t2, ((0, pad), (0, 0)))
        rows = sublane_mult

    max_block_rows, tile_budget, vmem_limit = _generation_budgets()

    # VMEM row cap: two inputs, double-buffered, lane-padded minor dim.
    per_row_bytes = _round_up(cols, _LANE) * (
        jnp.dtype(p2.dtype).itemsize + jnp.dtype(t2.dtype).itemsize)
    vmem_cap_rows = max(sublane_mult,
                        (tile_budget // (2 * per_row_bytes))
                        // sublane_mult * sublane_mult)

    chunk_rows = min(_CHUNK_ROWS, vmem_cap_rows)
    rows_rounded = _round_up(rows, sublane_mult)
    if rows_rounded <= chunk_rows:
        block_rows = rows_rounded          # tiny input: one block, one chunk
        chunk_rows = rows_rounded
    else:
        cap = min(max_block_rows, vmem_cap_rows)
        cap = max(chunk_rows, cap // chunk_rows * chunk_rows)
        # Keep >= _TARGET_MIN_BLOCKS grid steps when the input is big enough so
        # a dual-TC split (v7x) stays load balanced.
        target_block = _round_up(pl.cdiv(rows, _TARGET_MIN_BLOCKS), chunk_rows)
        block_rows = max(chunk_rows, min(cap, target_block))

    num_blocks = pl.cdiv(rows, block_rows)
    num_chunks = block_rows // chunk_rows
    need_mask = (rows % block_rows) != 0

    kernel = functools.partial(
        _partial_sum_kernel, total_rows=rows, block_rows=block_rows,
        chunk_rows=chunk_rows, num_chunks=num_chunks, num_blocks=num_blocks,
        need_mask=need_mask)

    # TODO(synk): on v7x, verify the "parallel" axis really shards across both
    # TensorCores; if not, switch to pltpu.CORE_PARALLEL / pl.core_map.
    # TODO(synk): sweep pipeline_mode=pl.Buffered(3) on the input specs if a
    # trace shows exposed DMA gaps between grid steps.
    partials = pl.pallas_call(
        kernel,
        out_shape=jax.ShapeDtypeStruct((num_blocks, _F32_SUBLANE, cols),
                                       jnp.float32),
        grid=(num_blocks,),
        in_specs=[
            pl.BlockSpec((block_rows, cols), lambda i: (i, 0)),
            pl.BlockSpec((block_rows, cols), lambda i: (i, 0)),
        ],
        # Squeeze the leading (per-block) dim: kernel sees an (8, C) ref.
        out_specs=pl.BlockSpec((None, _F32_SUBLANE, cols), lambda i: (i, 0, 0)),
        compiler_params=pltpu.CompilerParams(
            dimension_semantics=("parallel",),
            vmem_limit_bytes=vmem_limit,
        ),
    )(p2, t2)

    # Tiny final reduce + scalar math in plain JAX.
    total = jnp.sum(partials, dtype=jnp.float32)
    mean = total / jnp.float32(n_elems)
    return (jnp.float32(1.0) - jnp.abs(mean)) * jnp.float32(1000.0)


def _reference_loss(pred, target):
    prod = pred.astype(jnp.float32) * target.astype(jnp.float32)
    return (1.0 - jnp.abs(jnp.mean(prod))) * 1000.0


if __name__ == "__main__":
    key = jax.random.PRNGKey(0)
    k1, k2, k3, k4 = jax.random.split(key, 4)

    # 1) Small shape consistent with the module: single block, single chunk.
    pred = jax.random.normal(k1, (2, 4, 16, 16), dtype=jnp.float32)
    target = jax.random.normal(k2, (2, 4, 16, 16), dtype=jnp.float32)
    loss = jax.block_until_ready(custom_loss(pred, target))
    ref = _reference_loss(pred, target)
    assert jnp.allclose(loss, ref, rtol=1e-5, atol=1e-3), (loss, ref)

    # 2) Multi-block grid, multi-chunk accumulation, ragged (masked) last
    #    block, non-128 native minor dim (no wrapper-side pad or relayout).
    p3 = jax.random.normal(k1, (2, 4, 328, 100), dtype=jnp.float32)
    t3 = jax.random.normal(k2, (2, 4, 328, 100), dtype=jnp.float32)
    loss3 = jax.block_until_ready(custom_loss(p3, t3))
    ref3 = _reference_loss(p3, t3)
    assert jnp.allclose(loss3, ref3, rtol=1e-5, atol=1e-3), (loss3, ref3)

    # 3) bf16 inputs: exercises the dtype-aware (16,128) sublane tiling and the
    #    masked ragged tail with a packed dtype.
    p4 = jax.random.normal(k3, (4, 8, 40, 80), dtype=jnp.bfloat16)
    t4 = jax.random.normal(k4, (4, 8, 40, 80), dtype=jnp.bfloat16)
    loss4 = jax.block_until_ready(custom_loss(p4, t4))
    ref4 = _reference_loss(p4, t4)
    assert jnp.allclose(loss4, ref4, rtol=1e-4, atol=1e-2), (loss4, ref4)

    print("KERNEL_OK")
</pallas_src>

<mosaic_0001>
module attributes {stable_mosaic.version = 11 : i64} {
  func.func @_partial_sum_kernel(%arg0: i32, %arg1: memref<128x16xf32, #tpu.memory_space<vmem>>, %arg2: memref<128x16xf32, #tpu.memory_space<vmem>>, %arg3: memref<1x8x16xf32, #tpu.memory_space<vmem>>) attributes {dimension_semantics = [#tpu.dimension_semantics<parallel>], iteration_bounds = array<i64: 1>, scalar_prefetch = 0 : i64, scratch_operands = 0 : i64, tpu.core_type = #tpu.core_type<tc>, window_params = [{transform_indices = @transform_0, window_bounds = array<i64: 128, 16>}, {transform_indices = @transform_1, window_bounds = array<i64: 128, 16>}, {transform_indices = @transform_2, window_bounds = array<i64: 1, 8, 16>}]} {
    %c0 = arith.constant 0 : index
    %c0_0 = arith.constant 0 : index
    %0 = vector.load %arg1[%c0, %c0_0] : memref<128x16xf32, #tpu.memory_space<vmem>>, vector<128x16xf32>
    %c0_1 = arith.constant 0 : index
    %c0_2 = arith.constant 0 : index
    %1 = vector.load %arg2[%c0_1, %c0_2] : memref<128x16xf32, #tpu.memory_space<vmem>>, vector<128x16xf32>
    %2 = arith.mulf %0, %1 : vector<128x16xf32>
    %3 = vector.shape_cast %2 : vector<128x16xf32> to vector<16x8x16xf32>
    %cst = arith.constant dense<0.000000e+00> : vector<8x16xf32>
    %4 = vector.multi_reduction <add>, %3, %cst [0] : vector<16x8x16xf32> to vector<8x16xf32>
    %c0_3 = arith.constant 0 : index
    %c0_4 = arith.constant 0 : index
    %c0_5 = arith.constant 0 : index
    %5 = vector.load %arg3[%c0_3, %c0_4, %c0_5] : memref<1x8x16xf32, #tpu.memory_space<vmem>>, vector<1x8x16xf32>
    %6 = vector.shape_cast %5 : vector<1x8x16xf32> to vector<8x16xf32>
    %7 = vector.shape_cast %4 : vector<8x16xf32> to vector<1x8x16xf32>
    tpu.vector_store %arg3[%c0_3, %c0_4, %c0_5], %7 {strides = array<i32>} : memref<1x8x16xf32, #tpu.memory_space<vmem>>, vector<1x8x16xf32>,
    return
  }
  func.func @transform_0(%arg0: i32) -> (i32, i32) {
    %c0_i32 = arith.constant 0 : i32
    %c0_i32_0 = arith.constant 0 : i32
    return %arg0, %c0_i32 : i32, i32
  }
  func.func @transform_1(%arg0: i32) -> (i32, i32) {
    %c0_i32 = arith.constant 0 : i32
    %c0_i32_0 = arith.constant 0 : i32
    return %arg0, %c0_i32 : i32, i32
  }
  func.func @transform_2(%arg0: i32) -> (i32, i32, i32) {
    %c0_i32 = arith.constant 0 : i32
    %c0_i32_0 = arith.constant 0 : i32
    %c0_i32_1 = arith.constant 0 : i32
    return %arg0, %c0_i32, %c0_i32_0 : i32, i32, i32
  }
}

</mosaic_0001>

<bundles_post_ra>
// kernel: tpu_custom_call.1
= control target key start
LH: loop header
LB: loop body
LE: loop exit
PB: predicated region body
PF: predicated region fallthrough
CT: control target
= control target key end

     0   :  { %vm60_vm0 = vcmask 130048   ;;  %s268_s0 = inlined_call_operand.vmem [shape: f32[128,16], index: 0, kind: input, shape index: {}]   ;;  %s269_s1 = inlined_call_operand.vmem [shape: f32[128,16], index: 1, kind: input, shape index: {}]   ;;  %s270_s2 = inlined_call_operand.hbm [shape: f32[1,8,16], index: 2, kind: output, shape index: {}]  }
   0x1   :  { %v12_v0 = vld [vmem:[%s268_s0] sm:$0xff]  ;;  %v13_v1 = vld [vmem:[%s268_s0 + $0x8] sm:$0xff]  ;;  %v14_v2 = vld [vmem:[%s268_s0 + $0x10] sm:$0xff] }
   0x2   :  { %v15_v3 = vld [vmem:[%s268_s0 + $0x18] sm:$0xff]  ;;  %v16_v4 = vld [vmem:[%s268_s0 + $0x20] sm:$0xff]  ;;  %v29_v6 = vld [vmem:[%s269_s1 + $0x8] sm:$0xff] }
   0x3   :  { %v28_v5 = vld [vmem:[%s269_s1] sm:$0xff]  ;;  %v30_v7 = vld [vmem:[%s269_s1 + $0x10] sm:$0xff]  ;;  %v31_v8 = vld [vmem:[%s269_s1 + $0x18] sm:$0xff]  ;;  %v45_v11 = vmul.f32 %v29_v6, %v13_v1 }
   0x4   :  { %v32_v9 = vld [vmem:[%s269_s1 + $0x20] sm:$0xff]  ;;  %v44_v10 = vmul.f32 %v28_v5, %v12_v0  ;;  %v46_v12 = vmul.f32 %v30_v7, %v14_v2  ;;  %v47_v13 = vmul.f32 %v31_v8, %v15_v3  ;;  %v17_v14 = vld [vmem:[%s268_s0 + $0x28] sm:$0xff]  ;;  %v18_v19 = vld [vmem:[%s268_s0 + $0x30] sm:$0xff] }
   0x5   :  { %v33_v15 = vld [vmem:[%s269_s1 + $0x28] sm:$0xff]  ;;  %v48_v17 = vmul.f32 %v32_v9, %v16_v4  ;;  %v62_v18 = vsel %vm60_vm0, %v45_v11, 0.0  ;;  %v34_v20 = vld [vmem:[%s269_s1 + $0x30] sm:$0xff] }
   0x6   :  { %v61_v16 = vsel %vm60_vm0, %v44_v10, 0.0 }
   0x7   :  { %v63_v21 = vadd.f32 %v62_v18, %v61_v16 }
   0x8   :  { %7 = vsyncpa [#allocation3], 0  ;;  %v49_v22 = vmul.f32 %v33_v15, %v17_v14  ;;  %v64_v23 = vsel %vm60_vm0, %v46_v12, 0.0  ;;  %v66_v24 = vsel %vm60_vm0, %v47_v13, 0.0  ;;  %v19_v25 = vld [vmem:[%s268_s0 + $0x38] sm:$0xff]  ;;  %v50_v28 = vmul.f32 %v34_v20, %v18_v19  ;;  %v20_v30 = vld [vmem:[%s268_s0 + $0x40] sm:$0xff] }
   0x9   :  { %v35_v26 = vld [vmem:[%s269_s1 + $0x38] sm:$0xff]  ;;  %v65_v27 = vadd.f32 %v64_v23, %v63_v21  ;;  %v68_v29 = vsel %vm60_vm0, %v48_v17, 0.0  ;;  %v36_v31 = vld [vmem:[%s269_s1 + $0x40] sm:$0xff]  ;;  %v21_v35 = vld [vmem:[%s268_s0 + $0x48] sm:$0xff]  ;;  %s136_s17 = smov [#allocation2]  }
   0xa   :  { %v51_v33 = vmul.f32 %v35_v26, %v19_v25  ;;  %v70_v34 = vsel %vm60_vm0, %v49_v22, 0.0  ;;  %v37_v36 = vld [vmem:[%s269_s1 + $0x48] sm:$0xff]  ;;  %v52_v38 = vmul.f32 %v36_v31, %v20_v30  ;;  %v72_v39 = vsel %vm60_vm0, %v50_v28, 0.0  ;;  %v22_v40 = vld [vmem:[%s268_s0 + $0x50] sm:$0xff]  ;;  %v23_v45 = vld [vmem:[%s268_s0 + $0x58] sm:$0xff] }
   0xb   :  { %v67_v32 = vadd.f32 %v66_v24, %v65_v27  ;;  %v38_v41 = vld [vmem:[%s269_s1 + $0x50] sm:$0xff]  ;;  %v53_v43 = vmul.f32 %v37_v36, %v21_v35  ;;  %v39_v46 = vld [vmem:[%s269_s1 + $0x58] sm:$0xff]  ;;  %v24_v50 = vld [vmem:[%s268_s0 + $0x60] sm:$0xff] }
   0xc   :  { %v74_v44 = vsel %vm60_vm0, %v51_v33, 0.0  ;;  %v54_v48 = vmul.f32 %v38_v41, %v22_v40  ;;  %v76_v49 = vsel %vm60_vm0, %v52_v38, 0.0  ;;  %v40_v51 = vld [vmem:[%s269_s1 + $0x60] sm:$0xff]  ;;  %v55_v53 = vmul.f32 %v39_v46, %v23_v45  ;;  %v25_v55 = vld [vmem:[%s268_s0 + $0x68] sm:$0xff]  ;;  %v26_v60 = vld [vmem:[%s268_s0 + $0x70] sm:$0xff] }
   0xd   :  { %v69_v37 = vadd.f32 %v68_v29, %v67_v32  ;;  %v78_v54 = vsel %vm60_vm0, %v53_v43, 0.0  ;;  %v41_v56 = vld [vmem:[%s269_s1 + $0x68] sm:$0xff]  ;;  %v56_v58 = vmul.f32 %v40_v51, %v24_v50  ;;  %v42_v61 = vld [vmem:[%s269_s1 + $0x70] sm:$0xff]  ;;  %v27_v1 = vld [vmem:[%s268_s0 + $0x78] sm:$0xff]  ;;  %s98_s0 = sshll.u32 %s136_s17, 4  ;;  %s99_s0 = int_to_ptr.vmem [resolvable:$true] %s98_s0 }
   0xe   :  { %v80_v59 = vsel %vm60_vm0, %v54_v48, 0.0  ;;  %v57_v63 = vmul.f32 %v41_v56, %v25_v55  ;;  %v82_v0 = vsel %vm60_vm0, %v55_v53, 0.0  ;;  %v43_v2 = vld [vmem:[%s269_s1 + $0x78] sm:$0xff]  ;;  %v58_v4 = vmul.f32 %v42_v61, %v26_v60  ;;  %s100_s1 = sshll.u32 %s270_s2, 4  ;;  %s101_s1 = int_to_ptr.hbm [resolvable:$true] %s100_s1 }
   0xf   :  { %v71_v42 = vadd.f32 %v70_v34, %v69_v37  ;;  %v84_v5 = vsel %vm60_vm0, %v56_v58, 0.0  ;;  %v59_v7 = vmul.f32 %v43_v2, %v27_v1 }
  0x10   :  { %v86_v8 = vsel %vm60_vm0, %v57_v63, 0.0  ;;  %v88_v10 = vsel %vm60_vm0, %v58_v4, 0.0 }
  0x11   :  { %v73_v47 = vadd.f32 %v72_v39, %v71_v42  ;;  %v90_v12 = vsel %vm60_vm0, %v59_v7, 0.0 }
  0x13   :  { %v75_v52 = vadd.f32 %v74_v44, %v73_v47 }
  0x15   :  { %v77_v57 = vadd.f32 %v76_v49, %v75_v52 }
  0x17   :  { %v79_v62 = vadd.f32 %v78_v54, %v77_v57 }
  0x19   :  { %v81_v3 = vadd.f32 %v80_v59, %v79_v62 }
  0x1b   :  { %v83_v6 = vadd.f32 %v82_v0, %v81_v3 }
  0x1d   :  { %v85_v9 = vadd.f32 %v84_v5, %v83_v6 }
  0x1f   :  { %v87_v11 = vadd.f32 %v86_v8, %v85_v9 }
  0x21   :  { %v89_v13 = vadd.f32 %v88_v10, %v87_v11 }
  0x23   :  { %v91_v14 = vadd.f32 %v90_v12, %v89_v13 }
  0x25   :  { %92 = vst.msk [vmem:[#allocation2] sm:$0xff] %vm60_vm0, %v91_v14 }
  0x26   :  { %103 = dma.vmem_to_hbm [thread:$0]  %s99_s0, 128, %s101_s1, [#allocation3]  }
  0x27   :  { %134 = dma.done.wait [#allocation3], 128  }
  0x28   :  { %135 = vsyncadd [#allocation3], 4294967168 }
  0x29   :  { %108 = vsyncpa [#allocation3], 1 }

</bundles_post_ra>
